<compile_context>
chip_gen: v5e
topology: v5e:2x2
jax: 0.10.0
libtpu: 0.0.40
codegen_flags: <defaults>
</compile_context>

<pallas_src>
import jax
import jax.numpy as jnp
from jax.experimental import pallas as pl
from jax.experimental.pallas import tpu as pltpu


def predictor_mlp_kernel(obs_ref, act_ref,
                         w1_ref, b1_ref, w2_ref, b2_ref,
                         wa_ref, ba_ref,
                         w3_ref, b3_ref, w4_ref, b4_ref,
                         out_ref):
    cdt = w1_ref.dtype                  # matmul operand dtype (f32 or bf16)

    obs = obs_ref[...]                  # (TB, in_size), already in cdt
    act = act_ref[...]                  # (TB, 1), f32

    # fc_grp1: Linear + ReLU + Linear + ReLU   (MXU matmuls, f32 accumulation)
    h1 = jnp.dot(obs, w1_ref[...], preferred_element_type=jnp.float32) + b1_ref[...]
    h1 = jnp.maximum(h1, 0.0)
    h2 = jnp.dot(h1.astype(cdt), w2_ref[...],
                 preferred_element_type=jnp.float32) + b2_ref[...]
    h2 = jnp.maximum(h2, 0.0)

    # action_fc: Linear(1 -> hidden) + ReLU. K=1 matmul == broadcasted outer
    # product, so keep it on the VPU (in f32) instead of wasting the MXU.
    # The (TB, 1) column costs one lane-broadcast per vreg, which lands on the
    # otherwise-idle XLU slot, so a lane-dense action layout isn't worth the
    # extra transpose plumbing here.
    ae = jnp.maximum(act * wa_ref[...] + ba_ref[...], 0.0)      # (TB,1)*(1,H)+(1,H)

    prod = h2 * ae                       # f32 elementwise on the VPU

    # fc_grp2: Linear + ReLU + Linear
    h3 = jnp.dot(prod.astype(cdt), w3_ref[...],
                 preferred_element_type=jnp.float32) + b3_ref[...]
    h3 = jnp.maximum(h3, 0.0)
    out = jnp.dot(h3.astype(cdt), w4_ref[...],
                  preferred_element_type=jnp.float32) + b4_ref[...]

    out_ref[...] = out.astype(out_ref.dtype)


def _round_up(x, m):
    return ((x + m - 1) // m) * m


def _cdiv(a, b):
    return (a + b - 1) // b


def predictor_mlp(obs, action, params, *, max_tile_b=256,
                  compute_dtype=jnp.bfloat16,
                  vmem_limit_bytes=48 * 1024 * 1024):
    """obs: (B, in_size), action: (B, 1, 1) -> returns (B, out_size) float32.

    Batch tiles are capped at `max_tile_b` rows (256 fills the MXU M dimension on
    v6e/v7x) but sized to minimize padding for ragged batches.  compute_dtype=bf16
    keeps MXU operands bf16 with f32 accumulation; pass jnp.float32 for
    bit-faithful f32 matmuls.
    """
    B, in_size = obs.shape
    (w1, b1, w2, b2, wa, ba, w3, b3, w4, b4) = params
    hidden = w1.shape[1]
    out_size = w4.shape[1]

    # --- batch tiling: cap tile at max_tile_b, distribute rows evenly across
    # grid steps so padding stays minimal (sublane-aligned to 8 rows). ----------
    n_tiles = max(1, _cdiv(B, int(max_tile_b)))
    tile_b = _round_up(max(_cdiv(B, n_tiles), 8), 8)
    Bp = _round_up(B, tile_b)
    grid = (Bp // tile_b,)

    obs_p = obs.astype(compute_dtype)
    act_p = action.reshape(B, 1).astype(jnp.float32)   # squeeze(-1): (B,1,1)->(B,1)
    if Bp != B:
        obs_p = jnp.pad(obs_p, ((0, Bp - B), (0, 0)))
        act_p = jnp.pad(act_p, ((0, Bp - B), (0, 0)))

    # Matmul weights in compute_dtype (halves weight DMA bytes for bf16);
    # biases and the action path stay f32 for the VPU.
    w1c, w2c, w3c, w4c = (w.astype(compute_dtype) for w in (w1, w2, w3, w4))

    def fixed(shape):
        # Grid-invariant weight/bias blocks: constant index_map keeps them
        # resident in VMEM across the whole grid.  Total footprint here is well
        # under 1 MiB, so default double-buffering stays far inside the 32 MiB
        # scoped / 64 MiB physical (v7x) VMEM budget.
        return pl.BlockSpec(shape, lambda i: (0, 0))

    out_p = pl.pallas_call(
        predictor_mlp_kernel,
        out_shape=jax.ShapeDtypeStruct((Bp, out_size), jnp.float32),
        grid=grid,
        in_specs=[
            pl.BlockSpec((tile_b, in_size), lambda i: (i, 0)),   # obs tile
            pl.BlockSpec((tile_b, 1), lambda i: (i, 0)),         # action column
            fixed((in_size, hidden)), fixed((1, hidden)),        # W1, b1
            fixed((hidden, hidden)), fixed((1, hidden)),         # W2, b2
            fixed((1, hidden)), fixed((1, hidden)),              # Wa, ba
            fixed((hidden, hidden)), fixed((1, hidden)),         # W3, b3
            fixed((hidden, out_size)), fixed((1, out_size)),     # W4, b4
        ],
        out_specs=pl.BlockSpec((tile_b, out_size), lambda i: (i, 0)),
        compiler_params=pltpu.CompilerParams(
            # "parallel" lets megacore / v7x dual-TC shard the batch grid.
            dimension_semantics=("parallel",),
            # explicit budget, sized against v7x's 64 MiB (not 128 MiB).
            vmem_limit_bytes=vmem_limit_bytes),
    )(obs_p, act_p, w1c, b1, w2c, b2, wa, ba, w3c, b3, w4c, b4)

    return out_p[:B]


def init_params(key, in_size=128, hidden_size=256, out_size=128):
    """Deterministic init mimicking nn.Linear default (uniform +-1/sqrt(fan_in)).
    Weights are stored pre-transposed as (in_features, out_features)."""
    def linear(k, fan_in, fan_out):
        kw, kb = jax.random.split(k)
        bound = 1.0 / jnp.sqrt(float(fan_in))
        w = jax.random.uniform(kw, (fan_in, fan_out), jnp.float32, -bound, bound)
        b = jax.random.uniform(kb, (1, fan_out), jnp.float32, -bound, bound)
        return w, b

    k1, k2, ka, k3, k4 = jax.random.split(key, 5)
    w1, b1 = linear(k1, in_size, hidden_size)       # fc_grp1[0]
    w2, b2 = linear(k2, hidden_size, hidden_size)   # fc_grp1[2]
    wa, ba = linear(ka, 1, hidden_size)             # action_fc[0]
    w3, b3 = linear(k3, hidden_size, hidden_size)   # fc_grp2[0]
    w4, b4 = linear(k4, hidden_size, out_size)      # fc_grp2[2]
    return (w1, b1, w2, b2, wa, ba, w3, b3, w4, b4)


def reference_forward(obs, action, params, compute_dtype=jnp.float32):
    """Plain JAX reference of the PyTorch forward, with matmul operands cast to
    `compute_dtype` (f32 accumulation) to match the kernel's dtype policy."""
    (w1, b1, w2, b2, wa, ba, w3, b3, w4, b4) = params
    c = lambda x: x.astype(compute_dtype)
    a = action.reshape(action.shape[0], 1)
    h = jnp.maximum(
        jnp.dot(c(obs), c(w1), preferred_element_type=jnp.float32) + b1, 0.0)
    h = jnp.maximum(
        jnp.dot(c(h), c(w2), preferred_element_type=jnp.float32) + b2, 0.0)
    ae = jnp.maximum(a * wa + ba, 0.0)
    p = h * ae
    h3 = jnp.maximum(
        jnp.dot(c(p), c(w3), preferred_element_type=jnp.float32) + b3, 0.0)
    return jnp.dot(c(h3), c(w4), preferred_element_type=jnp.float32) + b4


if __name__ == "__main__":
    key = jax.random.PRNGKey(0)
    kp, ko, ka = jax.random.split(key, 3)

    in_size, hidden_size, out_size = 128, 256, 128
    params = init_params(kp, in_size, hidden_size, out_size)

    # --- small batch, f32 matmuls: bit-comparable to the f32 reference --------
    batch = 8
    obs = jax.random.normal(ko, (batch, in_size), jnp.float32)
    action = jax.random.normal(ka, (batch, 1, 1), jnp.float32)

    out_f32 = jax.block_until_ready(
        predictor_mlp(obs, action, params, compute_dtype=jnp.float32))
    ref_f32 = reference_forward(obs, action, params, jnp.float32)
    assert out_f32.shape == (batch, out_size)
    assert jnp.allclose(out_f32, ref_f32, atol=1e-4, rtol=1e-4)

    # --- larger ragged batch: exercises padding, multi-step grid, bf16 MXU ----
    batch2 = 300                                   # deliberately not tile-aligned
    obs2 = jax.random.normal(ko, (batch2, in_size), jnp.float32)
    action2 = jax.random.normal(ka, (batch2, 1, 1), jnp.float32)

    out_bf16 = jax.block_until_ready(
        predictor_mlp(obs2, action2, params, compute_dtype=jnp.bfloat16))
    ref_bf16 = reference_forward(obs2, action2, params, jnp.bfloat16)
    assert out_bf16.shape == (batch2, out_size)
    assert jnp.allclose(out_bf16, ref_bf16, atol=1e-2, rtol=1e-2)

    print("KERNEL_OK")
</pallas_src>

<mosaic_0001>
module attributes {stable_mosaic.version = 11 : i64} {
  func.func @predictor_mlp_kernel(%arg0: i32, %arg1: memref<8x128xf32, #tpu.memory_space<vmem>>, %arg2: memref<8x1xf32, #tpu.memory_space<vmem>>, %arg3: memref<128x256xf32, #tpu.memory_space<vmem>>, %arg4: memref<1x256xf32, #tpu.memory_space<vmem>>, %arg5: memref<256x256xf32, #tpu.memory_space<vmem>>, %arg6: memref<1x256xf32, #tpu.memory_space<vmem>>, %arg7: memref<1x256xf32, #tpu.memory_space<vmem>>, %arg8: memref<1x256xf32, #tpu.memory_space<vmem>>, %arg9: memref<256x256xf32, #tpu.memory_space<vmem>>, %arg10: memref<1x256xf32, #tpu.memory_space<vmem>>, %arg11: memref<256x128xf32, #tpu.memory_space<vmem>>, %arg12: memref<1x128xf32, #tpu.memory_space<vmem>>, %arg13: memref<8x128xf32, #tpu.memory_space<vmem>>) attributes {dimension_semantics = [#tpu.dimension_semantics<parallel>], iteration_bounds = array<i64: 1>, scalar_prefetch = 0 : i64, scratch_operands = 0 : i64, tpu.core_type = #tpu.core_type<tc>, window_params = [{transform_indices = @transform_0, window_bounds = array<i64: 8, 128>}, {transform_indices = @transform_1, window_bounds = array<i64: 8, 1>}, {pipeline_mode = #tpu.pipeline_mode<synchronous>, transform_indices = @transform_2, window_bounds = array<i64: 128, 256>}, {pipeline_mode = #tpu.pipeline_mode<synchronous>, transform_indices = @transform_3, window_bounds = array<i64: 1, 256>}, {pipeline_mode = #tpu.pipeline_mode<synchronous>, transform_indices = @transform_4, window_bounds = array<i64: 256, 256>}, {pipeline_mode = #tpu.pipeline_mode<synchronous>, transform_indices = @transform_5, window_bounds = array<i64: 1, 256>}, {pipeline_mode = #tpu.pipeline_mode<synchronous>, transform_indices = @transform_6, window_bounds = array<i64: 1, 256>}, {pipeline_mode = #tpu.pipeline_mode<synchronous>, transform_indices = @transform_7, window_bounds = array<i64: 1, 256>}, {pipeline_mode = #tpu.pipeline_mode<synchronous>, transform_indices = @transform_8, window_bounds = array<i64: 256, 256>}, {pipeline_mode = #tpu.pipeline_mode<synchronous>, transform_indices = @transform_9, window_bounds = array<i64: 1, 256>}, {pipeline_mode = #tpu.pipeline_mode<synchronous>, transform_indices = @transform_10, window_bounds = array<i64: 256, 128>}, {pipeline_mode = #tpu.pipeline_mode<synchronous>, transform_indices = @transform_11, window_bounds = array<i64: 1, 128>}, {transform_indices = @transform_12, window_bounds = array<i64: 8, 128>}]} {
    %c0 = arith.constant 0 : index
    %c0_0 = arith.constant 0 : index
    %0 = vector.load %arg1[%c0, %c0_0] : memref<8x128xf32, #tpu.memory_space<vmem>>, vector<8x128xf32>
    %c0_1 = arith.constant 0 : index
    %c0_2 = arith.constant 0 : index
    %1 = vector.load %arg2[%c0_1, %c0_2] : memref<8x1xf32, #tpu.memory_space<vmem>>, vector<8x1xf32>
    %c0_3 = arith.constant 0 : index
    %c0_4 = arith.constant 0 : index
    %2 = vector.load %arg3[%c0_3, %c0_4] : memref<128x256xf32, #tpu.memory_space<vmem>>, vector<128x256xf32>
    %cst = arith.constant dense<0.000000e+00> : vector<8x256xf32>
    %3 = tpu.matmul %0, %2, %cst {dimension_numbers = #tpu.dot_dimension_numbers<[1], [0], [0], [1], [0, 0, 1, 1], [], []>} : vector<8x128xf32>, vector<128x256xf32>, vector<8x256xf32> -> vector<8x256xf32>
    %c0_5 = arith.constant 0 : index
    %c0_6 = arith.constant 0 : index
    %4 = vector.load %arg4[%c0_5, %c0_6] : memref<1x256xf32, #tpu.memory_space<vmem>>, vector<1x256xf32>
    %5 = vector.broadcast %4 : vector<1x256xf32> to vector<8x256xf32>
    %6 = arith.addf %3, %5 : vector<8x256xf32>
    %cst_7 = arith.constant 0.000000e+00 : f32
    %7 = vector.broadcast %cst_7 : f32 to vector<8x256xf32>
    %8 = arith.maximumf %6, %7 : vector<8x256xf32>
    %c0_8 = arith.constant 0 : index
    %c0_9 = arith.constant 0 : index
    %9 = vector.load %arg5[%c0_8, %c0_9] : memref<256x256xf32, #tpu.memory_space<vmem>>, vector<256x256xf32>
    %cst_10 = arith.constant dense<0.000000e+00> : vector<8x256xf32>
    %10 = tpu.matmul %8, %9, %cst_10 {dimension_numbers = #tpu.dot_dimension_numbers<[1], [0], [0], [1], [0, 0, 1, 1], [], []>} : vector<8x256xf32>, vector<256x256xf32>, vector<8x256xf32> -> vector<8x256xf32>
    %c0_11 = arith.constant 0 : index
    %c0_12 = arith.constant 0 : index
    %11 = vector.load %arg6[%c0_11, %c0_12] : memref<1x256xf32, #tpu.memory_space<vmem>>, vector<1x256xf32>
    %12 = vector.broadcast %11 : vector<1x256xf32> to vector<8x256xf32>
    %13 = arith.addf %10, %12 : vector<8x256xf32>
    %cst_13 = arith.constant 0.000000e+00 : f32
    %14 = vector.broadcast %cst_13 : f32 to vector<8x256xf32>
    %15 = arith.maximumf %13, %14 : vector<8x256xf32>
    %c0_14 = arith.constant 0 : index
    %c0_15 = arith.constant 0 : index
    %16 = vector.load %arg7[%c0_14, %c0_15] : memref<1x256xf32, #tpu.memory_space<vmem>>, vector<1x256xf32>
    %17 = vector.broadcast %1 : vector<8x1xf32> to vector<8x256xf32>
    %18 = vector.broadcast %16 : vector<1x256xf32> to vector<8x256xf32>
    %19 = arith.mulf %17, %18 : vector<8x256xf32>
    %c0_16 = arith.constant 0 : index
    %c0_17 = arith.constant 0 : index
    %20 = vector.load %arg8[%c0_16, %c0_17] : memref<1x256xf32, #tpu.memory_space<vmem>>, vector<1x256xf32>
    %21 = vector.broadcast %20 : vector<1x256xf32> to vector<8x256xf32>
    %22 = arith.addf %19, %21 : vector<8x256xf32>
    %cst_18 = arith.constant 0.000000e+00 : f32
    %23 = vector.broadcast %cst_18 : f32 to vector<8x256xf32>
    %24 = arith.maximumf %22, %23 : vector<8x256xf32>
    %25 = arith.mulf %15, %24 : vector<8x256xf32>
    %c0_19 = arith.constant 0 : index
    %c0_20 = arith.constant 0 : index
    %26 = vector.load %arg9[%c0_19, %c0_20] : memref<256x256xf32, #tpu.memory_space<vmem>>, vector<256x256xf32>
    %cst_21 = arith.constant dense<0.000000e+00> : vector<8x256xf32>
    %27 = tpu.matmul %25, %26, %cst_21 {dimension_numbers = #tpu.dot_dimension_numbers<[1], [0], [0], [1], [0, 0, 1, 1], [], []>} : vector<8x256xf32>, vector<256x256xf32>, vector<8x256xf32> -> vector<8x256xf32>
    %c0_22 = arith.constant 0 : index
    %c0_23 = arith.constant 0 : index
    %28 = vector.load %arg10[%c0_22, %c0_23] : memref<1x256xf32, #tpu.memory_space<vmem>>, vector<1x256xf32>
    %29 = vector.broadcast %28 : vector<1x256xf32> to vector<8x256xf32>
    %30 = arith.addf %27, %29 : vector<8x256xf32>
    %cst_24 = arith.constant 0.000000e+00 : f32
    %31 = vector.broadcast %cst_24 : f32 to vector<8x256xf32>
    %32 = arith.maximumf %30, %31 : vector<8x256xf32>
    %c0_25 = arith.constant 0 : index
    %c0_26 = arith.constant 0 : index
    %33 = vector.load %arg11[%c0_25, %c0_26] : memref<256x128xf32, #tpu.memory_space<vmem>>, vector<256x128xf32>
    %cst_27 = arith.constant dense<0.000000e+00> : vector<8x128xf32>
    %34 = tpu.matmul %32, %33, %cst_27 {dimension_numbers = #tpu.dot_dimension_numbers<[1], [0], [0], [1], [0, 0, 1, 1], [], []>} : vector<8x256xf32>, vector<256x128xf32>, vector<8x128xf32> -> vector<8x128xf32>
    %c0_28 = arith.constant 0 : index
    %c0_29 = arith.constant 0 : index
    %35 = vector.load %arg12[%c0_28, %c0_29] : memref<1x128xf32, #tpu.memory_space<vmem>>, vector<1x128xf32>
    %36 = vector.broadcast %35 : vector<1x128xf32> to vector<8x128xf32>
    %37 = arith.addf %34, %36 : vector<8x128xf32>
    %c0_30 = arith.constant 0 : index
    %c0_31 = arith.constant 0 : index
    %38 = vector.load %arg13[%c0_30, %c0_31] : memref<8x128xf32, #tpu.memory_space<vmem>>, vector<8x128xf32>
    tpu.vector_store %arg13[%c0_30, %c0_31], %37 {strides = array<i32>} : memref<8x128xf32, #tpu.memory_space<vmem>>, vector<8x128xf32>,
    return
  }
  func.func @transform_0(%arg0: i32) -> (i32, i32) {
    %c0_i32 = arith.constant 0 : i32
    %c0_i32_0 = arith.constant 0 : i32
    return %arg0, %c0_i32 : i32, i32
  }
  func.func @transform_1(%arg0: i32) -> (i32, i32) {
    %c0_i32 = arith.constant 0 : i32
    %c0_i32_0 = arith.constant 0 : i32
    return %arg0, %c0_i32 : i32, i32
  }
  func.func @transform_2(%arg0: i32) -> (i32, i32) {
    %c0_i32 = arith.constant 0 : i32
    %c0_i32_0 = arith.constant 0 : i32
    %c0_i32_1 = arith.constant 0 : i32
    return %c0_i32, %c0_i32_0 : i32, i32
  }
  func.func @transform_3(%arg0: i32) -> (i32, i32) {
    %c0_i32 = arith.constant 0 : i32
    %c0_i32_0 = arith.constant 0 : i32
    %c0_i32_1 = arith.constant 0 : i32
    return %c0_i32, %c0_i32_0 : i32, i32
  }
  func.func @transform_4(%arg0: i32) -> (i32, i32) {
    %c0_i32 = arith.constant 0 : i32
    %c0_i32_0 = arith.constant 0 : i32
    %c0_i32_1 = arith.constant 0 : i32
    return %c0_i32, %c0_i32_0 : i32, i32
  }
  func.func @transform_5(%arg0: i32) -> (i32, i32) {
    %c0_i32 = arith.constant 0 : i32
    %c0_i32_0 = arith.constant 0 : i32
    %c0_i32_1 = arith.constant 0 : i32
    return %c0_i32, %c0_i32_0 : i32, i32
  }
  func.func @transform_6(%arg0: i32) -> (i32, i32) {
    %c0_i32 = arith.constant 0 : i32
    %c0_i32_0 = arith.constant 0 : i32
    %c0_i32_1 = arith.constant 0 : i32
    return %c0_i32, %c0_i32_0 : i32, i32
  }
  func.func @transform_7(%arg0: i32) -> (i32, i32) {
    %c0_i32 = arith.constant 0 : i32
    %c0_i32_0 = arith.constant 0 : i32
    %c0_i32_1 = arith.constant 0 : i32
    return %c0_i32, %c0_i32_0 : i32, i32
  }
  func.func @transform_8(%arg0: i32) -> (i32, i32) {
    %c0_i32 = arith.constant 0 : i32
    %c0_i32_0 = arith.constant 0 : i32
    %c0_i32_1 = arith.constant 0 : i32
    return %c0_i32, %c0_i32_0 : i32, i32
  }
  func.func @transform_9(%arg0: i32) -> (i32, i32) {
    %c0_i32 = arith.constant 0 : i32
    %c0_i32_0 = arith.constant 0 : i32
    %c0_i32_1 = arith.constant 0 : i32
    return %c0_i32, %c0_i32_0 : i32, i32
  }
  func.func @transform_10(%arg0: i32) -> (i32, i32) {
    %c0_i32 = arith.constant 0 : i32
    %c0_i32_0 = arith.constant 0 : i32
    %c0_i32_1 = arith.constant 0 : i32
    return %c0_i32, %c0_i32_0 : i32, i32
  }
  func.func @transform_11(%arg0: i32) -> (i32, i32) {
    %c0_i32 = arith.constant 0 : i32
    %c0_i32_0 = arith.constant 0 : i32
    %c0_i32_1 = arith.constant 0 : i32
    return %c0_i32, %c0_i32_0 : i32, i32
  }
  func.func @transform_12(%arg0: i32) -> (i32, i32) {
    %c0_i32 = arith.constant 0 : i32
    %c0_i32_0 = arith.constant 0 : i32
    return %arg0, %c0_i32 : i32, i32
  }
}

</mosaic_0001>

<bundles_post_ra>
// kernel: tpu_custom_call.1
= control target key start
LH: loop header
LB: loop body
LE: loop exit
PB: predicated region body
PF: predicated region fallthrough
CT: control target
= control target key end

     0   :  { %17 = vsyncpa [#allocation3], 0  ;;  %s905_s0 = inlined_call_operand.vmem [shape: f32[8,128], index: 0, kind: input, shape index: {}]   ;;  %s906_s1 = inlined_call_operand.vmem [shape: f32[8,1], index: 1, kind: input, shape index: {}]   ;;  %s907_s2 = inlined_call_operand.hbm [shape: f32[128,256], index: 2, kind: input, shape index: {}]   ;;  %s908_s3 = inlined_call_operand.vmem [shape: f32[1,256], index: 3, kind: input, shape index: {}]   ;;  %s909_s4 = inlined_call_operand.hbm [shape: f32[256,256], index: 4, kind: input, shape index: {}]   ;;  %s910_s5 = inlined_call_operand.vmem [shape: f32[1,256], index: 5, kind: input, shape index: {}]   ;;  %s911_s6 = inlined_call_operand.vmem [shape: f32[1,256], index: 6, kind: input, shape index: {}]   ;;  %s912_s7 = inlined_call_operand.hbm [shape: f32[1,256], index: 7, kind: input, shape index: {}]   ;;  %s913_s8 = inlined_call_operand.hbm [shape: f32[256,256], index: 8, kind: input, shape index: {}]   ;;  %s914_s9 = inlined_call_operand.vmem [shape: f32[1,256], index: 9, kind: input, shape index: {}]   ;;  %s915_s10 = inlined_call_operand.hbm [shape: f32[256,128], index: 10, kind: input, shape index: {}]   ;;  %s916_s11 = inlined_call_operand.vmem [shape: f32[1,128], index: 11, kind: input, shape index: {}]   ;;  %s917_s12 = inlined_call_operand.hbm [shape: f32[8,128], index: 12, kind: output, shape index: {}]  }
   0x1   :  { %18 = vsyncpa [#allocation6], 0 }
   0x2   :  { %19 = vsyncpa [#allocation9], 0 }
   0x3   :  { %20 = vsyncpa [#allocation4], 0  ;;  %s44_s23 = sshll.u32 %s909_s4, 4  ;;  %s790_s24 = smov [#allocation5]   ;;  %s45_s23 = int_to_ptr.hbm [resolvable:$true] %s44_s23 }
   0x4   :  { %s46_s25 = sshll.u32 %s790_s24, 4  ;;  %s72_s28 = sshll.u32 %s913_s8, 4  ;;  %s47_s25 = int_to_ptr.vmem [resolvable:$true] %s46_s25  ;;  %s73_s28 = int_to_ptr.hbm [resolvable:$true] %s72_s28 }
   0x5   :  { %s791_s29 = smov 256   ;;  %s792_s30 = smov 16  }
   0x6   :  { %52 = dma.hbm_to_vmem [thread:$0]  %s45_s23, 8192, %s47_s25, [#allocation6], %s791_s29, %s791_s29, %s792_s30  }
   0x7   :  { %s793_s13 = smov [#allocation8]   ;;  %s29_s17 = sshll.u32 %s907_s2, 4  ;;  %s30_s17 = int_to_ptr.hbm [resolvable:$true] %s29_s17 }
   0x8   :  { %s74_s14 = sshll.u32 %s793_s13, 4  ;;  %s62_s19 = sshll.u32 %s912_s7, 4  ;;  %s75_s14 = int_to_ptr.vmem [resolvable:$true] %s74_s14  ;;  %s63_s19 = int_to_ptr.hbm [resolvable:$true] %s62_s19 }
   0x9   :  { %80 = dma.hbm_to_vmem [thread:$0]  %s73_s28, 8192, %s75_s14, [#allocation9], %s791_s29, %s791_s29, %s792_s30  }
   0xa   :  { %s794_s20 = smov [#allocation2]   ;;  %s795_s8 = smov [#allocation7]  }
   0xb   :  { %s31_s21 = sshll.u32 %s794_s20, 4  ;;  %s64_s22 = sshll.u32 %s795_s8, 4  ;;  %s32_s21 = int_to_ptr.vmem [resolvable:$true] %s31_s21  ;;  %s65_s22 = int_to_ptr.vmem [resolvable:$true] %s64_s22 }
   0xc   :  { %37 = dma.hbm_to_vmem [thread:$0]  %s30_s17, 4096, %s32_s21, [#allocation3], %s791_s29, %s791_s29, %s792_s30  }
   0xd   :  { %s87_s25 = sshll.u32 %s915_s10, 4  ;;  %s796_s2 = smov [#allocation10]   ;;  %s88_s25 = int_to_ptr.hbm [resolvable:$true] %s87_s25 }
   0xe   :  { %67 = dma.hbm_to_vmem [thread:$0]  %s63_s19, 32, %s65_s22, [#allocation6]  }
   0xf   :  { %s89_s26 = sshll.u32 %s796_s2, 4  ;;  %s797_s27 = smov 128   ;;  %s90_s26 = int_to_ptr.vmem [resolvable:$true] %s89_s26 }
  0x10   :  { %s798_s28 = smov 8  }
  0x11   :  { %95 = dma.hbm_to_vmem [thread:$0]  %s88_s25, 4096, %s90_s26, [#allocation9], %s797_s27, %s797_s27, %s798_s28  }
  0x12   :  { %782 = dma.done.wait [#allocation3], 4096  }
  0x13   :  { %783 = vsyncadd [#allocation3], 4294963200 }
  0x14   :  { %784 = dma.done.wait [#allocation6], 8224  }
  0x15   :  { %785 = vsyncadd [#allocation6], 4294959072 }
  0x16   :  { %786 = dma.done.wait [#allocation9], 12288  }
  0x17   :  { %787 = vsyncadd [#allocation9], 4294955008  ;;  %v150_v0 = vld [vmem:[#allocation2 + $0xf0] sm:$0xff]  ;;  %v148_v1 = vld [vmem:[#allocation2 + $0xe0] sm:$0xff]  ;;  %s613_s20 = sshll.u32 %s917_s12, 4  ;;  %s614_s20 = int_to_ptr.hbm [resolvable:$true] %s613_s20 }
  0x18   :  { %v151_v2 = vld [vmem:[#allocation2 + $0xf8] sm:$0xff]  ;;  %158 = vmatpush.msra.mxu0 %v150_v0  ;;  %v149_v3 = vld [vmem:[#allocation2 + $0xe8] sm:$0xff]  ;;  %v146_v4 = vld [vmem:[#allocation2 + $0xd0] sm:$0xff] }
  0x19   :  { %178 = vmatpush.msra.mxu1 %v151_v2  ;;  %v147_v5 = vld [vmem:[#allocation2 + $0xd8] sm:$0xff]  ;;  %v144_v6 = vld [vmem:[#allocation2 + $0xc0] sm:$0xff]  ;;  %v145_v7 = vld [vmem:[#allocation2 + $0xc8] sm:$0xff] }
  0x1a   :  { %159 = vmatpush.msra.mxu0 %v148_v1  ;;  %v142_v8 = vld [vmem:[#allocation2 + $0xb0] sm:$0xff]  ;;  %v143_v9 = vld [vmem:[#allocation2 + $0xb8] sm:$0xff]  ;;  %v140_v10 = vld [vmem:[#allocation2 + $0xa0] sm:$0xff] }
  0x1b   :  { %179 = vmatpush.msra.mxu1 %v149_v3  ;;  %v141_v11 = vld [vmem:[#allocation2 + $0xa8] sm:$0xff]  ;;  %v138_v12 = vld [vmem:[#allocation2 + $0x90] sm:$0xff]  ;;  %v139_v13 = vld [vmem:[#allocation2 + $0x98] sm:$0xff] }
  0x1c   :  { %160 = vmatpush.msra.mxu0 %v146_v4  ;;  %v230_v14 = vld [vmem:[#allocation5 + $0xf0] sm:$0xff]  ;;  %v228_v15 = vld [vmem:[#allocation5 + $0xe0] sm:$0xff]  ;;  %v137_v17 = vld [vmem:[#allocation2 + $0x88] sm:$0xff] }
  0x1d   :  { %180 = vmatpush.msra.mxu1 %v147_v5  ;;  %v136_v16 = vld [vmem:[#allocation2 + $0x80] sm:$0xff]  ;;  %270 = vmatpush.msra.mxu2 %v230_v14  ;;  %v262_v18 = vld [vmem:[#allocation5 + $0x1f0] sm:$0xff]  ;;  %v135_v22 = vld [vmem:[#allocation2 + $0x78] sm:$0xff] }
  0x1e   :  { %161 = vmatpush.msra.mxu0 %v144_v6  ;;  %v226_v19 = vld [vmem:[#allocation5 + $0xd0] sm:$0xff]  ;;  %v260_v20 = vld [vmem:[#allocation5 + $0x1e0] sm:$0xff]  ;;  %290 = vmatpush.msra.mxu3 %v262_v18  ;;  %v133_v26 = vld [vmem:[#allocation2 + $0x68] sm:$0xff] }
  0x1f   :  { %181 = vmatpush.msra.mxu1 %v145_v7  ;;  %v134_v21 = vld [vmem:[#allocation2 + $0x70] sm:$0xff]  ;;  %271 = vmatpush.msra.mxu2 %v228_v15  ;;  %v224_v23 = vld [vmem:[#allocation5 + $0xc0] sm:$0xff]  ;;  %v131_v30 = vld [vmem:[#allocation2 + $0x58] sm:$0xff] }
  0x20   :  { %162 = vmatpush.msra.mxu0 %v142_v8  ;;  %v258_v24 = vld [vmem:[#allocation5 + $0x1d0] sm:$0xff]  ;;  %v132_v25 = vld [vmem:[#allocation2 + $0x60] sm:$0xff]  ;;  %291 = vmatpush.msra.mxu3 %v260_v20  ;;  %v129_v34 = vld [vmem:[#allocation2 + $0x48] sm:$0xff] }
  0x21   :  { %182 = vmatpush.msra.mxu1 %v143_v9  ;;  %272 = vmatpush.msra.mxu2 %v226_v19  ;;  %v222_v27 = vld [vmem:[#allocation5 + $0xb0] sm:$0xff]  ;;  %v256_v28 = vld [vmem:[#allocation5 + $0x1c0] sm:$0xff]  ;;  %v127_v38 = vld [vmem:[#allocation2 + $0x38] sm:$0xff] }
  0x22   :  { %163 = vmatpush.msra.mxu0 %v140_v10  ;;  %v130_v29 = vld [vmem:[#allocation2 + $0x50] sm:$0xff]  ;;  %292 = vmatpush.msra.mxu3 %v258_v24  ;;  %v220_v31 = vld [vmem:[#allocation5 + $0xa0] sm:$0xff]  ;;  %v125_v42 = vld [vmem:[#allocation2 + $0x28] sm:$0xff] }
  0x23   :  { %183 = vmatpush.msra.mxu1 %v141_v11  ;;  %273 = vmatpush.msra.mxu2 %v224_v23  ;;  %v254_v32 = vld [vmem:[#allocation5 + $0x1b0] sm:$0xff]  ;;  %v128_v33 = vld [vmem:[#allocation2 + $0x40] sm:$0xff]  ;;  %v123_v46 = vld [vmem:[#allocation2 + $0x18] sm:$0xff] }
  0x24   :  { %164 = vmatpush.msra.mxu0 %v138_v12  ;;  %293 = vmatpush.msra.mxu3 %v256_v28  ;;  %v218_v35 = vld [vmem:[#allocation5 + $0x90] sm:$0xff]  ;;  %v252_v36 = vld [vmem:[#allocation5 + $0x1a0] sm:$0xff]  ;;  %v121_v50 = vld [vmem:[#allocation2 + $0x8] sm:$0xff] }
  0x25   :  { %184 = vmatpush.msra.mxu1 %v139_v13  ;;  %274 = vmatpush.msra.mxu2 %v222_v27  ;;  %v126_v37 = vld [vmem:[#allocation2 + $0x30] sm:$0xff]  ;;  %v216_v39 = vld [vmem:[#allocation5 + $0x80] sm:$0xff]  ;;  %v231_v52 = vld [vmem:[#allocation5 + $0xf8] sm:$0xff] }
  0x26   :  { %165 = vmatpush.msra.mxu0 %v136_v16  ;;  %294 = vmatpush.msra.mxu3 %v254_v32  ;;  %v250_v40 = vld [vmem:[#allocation5 + $0x190] sm:$0xff]  ;;  %v124_v41 = vld [vmem:[#allocation2 + $0x20] sm:$0xff]  ;;  %v263_v53 = vld [vmem:[#allocation5 + $0x1f8] sm:$0xff] }
  0x27   :  { %185 = vmatpush.msra.mxu1 %v137_v17  ;;  %275 = vmatpush.msra.mxu2 %v220_v31  ;;  %v214_v43 = vld [vmem:[#allocation5 + $0x70] sm:$0xff]  ;;  %v248_v44 = vld [vmem:[#allocation5 + $0x180] sm:$0xff]  ;;  %v229_v56 = vld [vmem:[#allocation5 + $0xe8] sm:$0xff] }
  0x28   :  { %166 = vmatpush.msra.mxu0 %v134_v21  ;;  %295 = vmatpush.msra.mxu3 %v252_v36  ;;  %v122_v45 = vld [vmem:[#allocation2 + $0x10] sm:$0xff]  ;;  %v212_v47 = vld [vmem:[#allocation5 + $0x60] sm:$0xff]  ;;  %v261_v57 = vld [vmem:[#allocation5 + $0x1e8] sm:$0xff]  ;;  %v799_v36 = vmov 0  }
  0x29   :  { %186 = vmatpush.msra.mxu1 %v135_v22  ;;  %276 = vmatpush.msra.mxu2 %v218_v35  ;;  %v246_v48 = vld [vmem:[#allocation5 + $0x170] sm:$0xff]  ;;  %v120_v49 = vld [vmem:[#allocation2] sm:$0xff]  ;;  %v227_v60 = vld [vmem:[#allocation5 + $0xd8] sm:$0xff] }
  0x2a   :  { %167 = vmatpush.msra.mxu0 %v132_v25  ;;  %296 = vmatpush.msra.mxu3 %v250_v40  ;;  %v118_v51 = vld [vmem:[%s905_s0] sm:$0xff]  ;;  %v210_v54 = vld [vmem:[#allocation5 + $0x50] sm:$0xff]  ;;  %v259_v61 = vld [vmem:[#allocation5 + $0x1d8] sm:$0xff] }
  0x2b   :  { %187 = vmatpush.msra.mxu1 %v133_v26  ;;  %277 = vmatpush.msra.mxu2 %v216_v39  ;;  %v244_v55 = vld [vmem:[#allocation5 + $0x160] sm:$0xff]  ;;  %v242_v59 = vld [vmem:[#allocation5 + $0x150] sm:$0xff]  ;;  %v225_v0 = vld [vmem:[#allocation5 + $0xc8] sm:$0xff] }
  0x2c   :  { %168 = vmatpush.msra.mxu0 %v130_v29  ;;  %297 = vmatpush.msra.mxu3 %v248_v44  ;;  %v208_v58 = vld [vmem:[#allocation5 + $0x40] sm:$0xff]  ;;  %v206_v62 = vld [vmem:[#allocation5 + $0x30] sm:$0xff]  ;;  %v257_v1 = vld [vmem:[#allocation5 + $0x1c8] sm:$0xff] }
  0x2d   :  { %188 = vmatpush.msra.mxu1 %v131_v30  ;;  %278 = vmatpush.msra.mxu2 %v214_v43  ;;  %v240_v63 = vld [vmem:[#allocation5 + $0x140] sm:$0xff]  ;;  %v223_v2 = vld [vmem:[#allocation5 + $0xb8] sm:$0xff]  ;;  %v221_v4 = vld [vmem:[#allocation5 + $0xa8] sm:$0xff] }
  0x2e   :  { %169 = vmatpush.msra.mxu0 %v128_v33  ;;  %298 = vmatpush.msra.mxu3 %v246_v48  ;;  %v255_v3 = vld [vmem:[#allocation5 + $0x1b8] sm:$0xff]  ;;  %v253_v5 = vld [vmem:[#allocation5 + $0x1a8] sm:$0xff]  ;;  %v204_v19 = vld [vmem:[#allocation5 + $0x20] sm:$0xff] }
  0x2f   :  { %189 = vmatpush.msra.mxu1 %v129_v34  ;;  %279 = vmatpush.msra.mxu2 %v212_v47  ;;  %v219_v6 = vld [vmem:[#allocation5 + $0x98] sm:$0xff]  ;;  %v217_v8 = vld [vmem:[#allocation5 + $0x88] sm:$0xff]  ;;  %v238_v20 = vld [vmem:[#allocation5 + $0x130] sm:$0xff] }
  0x30   :  { %170 = vmatpush.msra.mxu0 %v126_v37  ;;  %299 = vmatpush.msra.mxu3 %v244_v55  ;;  %v251_v7 = vld [vmem:[#allocation5 + $0x198] sm:$0xff]  ;;  %v249_v9 = vld [vmem:[#allocation5 + $0x188] sm:$0xff]  ;;  %v202_v23 = vld [vmem:[#allocation5 + $0x10] sm:$0xff] }
  0x31   :  { %190 = vmatpush.msra.mxu1 %v127_v38  ;;  %280 = vmatpush.msra.mxu2 %v210_v54  ;;  %v215_v10 = vld [vmem:[#allocation5 + $0x78] sm:$0xff]  ;;  %v213_v12 = vld [vmem:[#allocation5 + $0x68] sm:$0xff]  ;;  %v236_v24 = vld [vmem:[#allocation5 + $0x120] sm:$0xff] }
  0x32   :  { %171 = vmatpush.msra.mxu0 %v124_v41  ;;  %300 = vmatpush.msra.mxu3 %v242_v59  ;;  %v247_v11 = vld [vmem:[#allocation5 + $0x178] sm:$0xff]  ;;  %v245_v13 = vld [vmem:[#allocation5 + $0x168] sm:$0xff]  ;;  %v200_v27 = vld [vmem:[#allocation5] sm:$0xff] }
  0x33   :  { %191 = vmatpush.msra.mxu1 %v125_v42  ;;  %281 = vmatpush.msra.mxu2 %v208_v58  ;;  %v211_v14 = vld [vmem:[#allocation5 + $0x58] sm:$0xff]  ;;  %v209_v16 = vld [vmem:[#allocation5 + $0x48] sm:$0xff]  ;;  %v234_v28 = vld [vmem:[#allocation5 + $0x110] sm:$0xff] }
  0x34   :  { %172 = vmatpush.msra.mxu0 %v122_v45  ;;  %301 = vmatpush.msra.mxu3 %v240_v63  ;;  %v243_v15 = vld [vmem:[#allocation5 + $0x158] sm:$0xff]  ;;  %v241_v17 = vld [vmem:[#allocation5 + $0x148] sm:$0xff]  ;;  %v232_v31 = vld [vmem:[#allocation5 + $0x100] sm:$0xff] }
  0x35   :  { %192 = vmatpush.msra.mxu1 %v123_v46  ;;  %282 = vmatpush.msra.mxu2 %v206_v62  ;;  %v207_v18 = vld [vmem:[#allocation5 + $0x38] sm:$0xff]  ;;  %v205_v21 = vld [vmem:[#allocation5 + $0x28] sm:$0xff]  ;;  %v119_v33 = vld [vmem:[%s906_s1] sm:$0xff] }
  0x36   :  { %173 = vmatpush.msra.mxu0 %v120_v49  ;;  %302 = vmatpush.msra.mxu3 %v238_v20  ;;  %v239_v22 = vld [vmem:[#allocation5 + $0x138] sm:$0xff]  ;;  %v237_v26 = vld [vmem:[#allocation5 + $0x128] sm:$0xff] }
  0x37   :  { %193 = vmatpush.msra.mxu1 %v121_v50  ;;  %174 = vmatmul.f32.vlgmr.msra.gmra.mxu0 %v118_v51  ;;  %v203_v25 = vld [vmem:[#allocation5 + $0x18] sm:$0xff]  ;;  %v201_v29 = vld [vmem:[#allocation5 + $0x8] sm:$0xff] }
  0x38   :  { %194 = vmatmul.f32.vlgmr.msra.gmra.mxu1 %v118_v51  ;;  %310 = vmatpush.msrb.mxu0 %v231_v52  ;;  %v235_v30 = vld [vmem:[#allocation5 + $0x118] sm:$0xff]  ;;  %v233_v32 = vld [vmem:[#allocation5 + $0x108] sm:$0xff] }
  0x39   :  { %330 = vmatpush.msrb.mxu1 %v263_v53  ;;  %283 = vmatpush.msra.mxu2 %v204_v19  ;;  %v439_v34 = vld [vmem:[#allocation8 + $0x1f0] sm:$0xff]  ;;  %v440_v35 = vld [vmem:[#allocation8 + $0x1f8] sm:$0xff]  ;;  %v437_v37 = vld [vmem:[#allocation8 + $0x1e0] sm:$0xff] }
  0x3a   :  { %311 = vmatpush.msrb.mxu0 %v229_v56  ;;  %303 = vmatpush.msra.mxu3 %v236_v24  ;;  %v438_v38 = vld [vmem:[#allocation8 + $0x1e8] sm:$0xff]  ;;  %v407_v39 = vld [vmem:[#allocation8 + $0xf0] sm:$0xff]  ;;  %v408_v41 = vld [vmem:[#allocation8 + $0xf8] sm:$0xff] }
  0x3b   :  { %331 = vmatpush.msrb.mxu1 %v261_v57  ;;  %284 = vmatpush.msra.mxu2 %v202_v23  ;;  %v435_v40 = vld [vmem:[#allocation8 + $0x1d0] sm:$0xff]  ;;  %v405_v42 = vld [vmem:[#allocation8 + $0xe0] sm:$0xff]  ;;  %v436_v43 = vld [vmem:[#allocation8 + $0x1d8] sm:$0xff] }
  0x3c   :  { %312 = vmatpush.msrb.mxu0 %v227_v60  ;;  %304 = vmatpush.msra.mxu3 %v234_v28  ;;  %v406_v44 = vld [vmem:[#allocation8 + $0xe8] sm:$0xff]  ;;  %v433_v45 = vld [vmem:[#allocation8 + $0x1c0] sm:$0xff]  ;;  %v403_v46 = vld [vmem:[#allocation8 + $0xd0] sm:$0xff] }
  0x3d   :  { %332 = vmatpush.msrb.mxu1 %v259_v61  ;;  %285 = vmatpush.msra.mxu2 %v200_v27  ;;  %v404_v47 = vld [vmem:[#allocation8 + $0xd8] sm:$0xff]  ;;  %v434_v48 = vld [vmem:[#allocation8 + $0x1c8] sm:$0xff]  ;;  %v401_v49 = vld [vmem:[#allocation8 + $0xc0] sm:$0xff] }
  0x3e   :  { %313 = vmatpush.msrb.mxu0 %v225_v0  ;;  %305 = vmatpush.msra.mxu3 %v232_v31  ;;  %v431_v50 = vld [vmem:[#allocation8 + $0x1b0] sm:$0xff]  ;;  %v402_v51 = vld [vmem:[#allocation8 + $0xc8] sm:$0xff]  ;;  %v432_v52 = vld [vmem:[#allocation8 + $0x1b8] sm:$0xff] }
  0x3f   :  { %333 = vmatpush.msrb.mxu1 %v257_v1  ;;  %636 = vset.pattern.permute.xlu0 %v799_v36  ;;  %v399_v53 = vld [vmem:[#allocation8 + $0xb0] sm:$0xff]  ;;  %v429_v54 = vld [vmem:[#allocation8 + $0x1a0] sm:$0xff]  ;;  %v400_v55 = vld [vmem:[#allocation8 + $0xb8] sm:$0xff] }
  0x40   :  { %314 = vmatpush.msrb.mxu0 %v223_v2  ;;  %355 = vperm.xlu0 %636, %v119_v33   ;;  %v430_v56 = vld [vmem:[#allocation8 + $0x1a8] sm:$0xff]  ;;  %v397_v57 = vld [vmem:[#allocation8 + $0xa0] sm:$0xff]  ;;  %v427_v58 = vld [vmem:[#allocation8 + $0x190] sm:$0xff] }
  0x41   :  { %334 = vmatpush.msrb.mxu1 %v255_v3  ;;  %467 = vmatpush.msrb.mxu3 %v439_v34  ;;  %v398_v59 = vld [vmem:[#allocation8 + $0xa8] sm:$0xff]  ;;  %v428_v60 = vld [vmem:[#allocation8 + $0x198] sm:$0xff]  ;;  %v395_v61 = vld [vmem:[#allocation8 + $0x90] sm:$0xff] }
  0x42   :  { %315 = vmatpush.msrb.mxu0 %v221_v4  ;;  %447 = vmatpush.msrb.mxu2 %v407_v39  ;;  %v425_v62 = vld [vmem:[#allocation8 + $0x180] sm:$0xff]  ;;  %v396_v63 = vld [vmem:[#allocation8 + $0x98] sm:$0xff]  ;;  %v426_v0 = vld [vmem:[#allocation8 + $0x188] sm:$0xff] }
  0x43   :  { %335 = vmatpush.msrb.mxu1 %v253_v5  ;;  %468 = vmatpush.msrb.mxu3 %v437_v37  ;;  %v393_v1 = vld [vmem:[#allocation8 + $0x80] sm:$0xff]  ;;  %v423_v2 = vld [vmem:[#allocation8 + $0x170] sm:$0xff]  ;;  %v394_v3 = vld [vmem:[#allocation8 + $0x88] sm:$0xff] }
  0x44   :  { %316 = vmatpush.msrb.mxu0 %v219_v6  ;;  %448 = vmatpush.msrb.mxu2 %v405_v42  ;;  %v424_v4 = vld [vmem:[#allocation8 + $0x178] sm:$0xff]  ;;  %v391_v5 = vld [vmem:[#allocation8 + $0x70] sm:$0xff]  ;;  %v421_v6 = vld [vmem:[#allocation8 + $0x160] sm:$0xff] }
  0x45   :  { %336 = vmatpush.msrb.mxu1 %v251_v7  ;;  %469 = vmatpush.msrb.mxu3 %v435_v40  ;;  %v422_v7 = vld [vmem:[#allocation8 + $0x168] sm:$0xff]  ;;  %v392_v20 = vld [vmem:[#allocation8 + $0x78] sm:$0xff]  ;;  %v415_v23 = vld [vmem:[#allocation8 + $0x130] sm:$0xff] }
  0x46   :  { %317 = vmatpush.msrb.mxu0 %v217_v8  ;;  %449 = vmatpush.msrb.mxu2 %v403_v46  ;;  %v419_v8 = vld [vmem:[#allocation8 + $0x150] sm:$0xff]  ;;  %v390_v24 = vld [vmem:[#allocation8 + $0x68] sm:$0xff]  ;;  %v413_v27 = vld [vmem:[#allocation8 + $0x120] sm:$0xff] }
  0x47   :  { %337 = vmatpush.msrb.mxu1 %v249_v9  ;;  %470 = vmatpush.msrb.mxu3 %v433_v45  ;;  %v152_v9 = vld [vmem:[%s908_s3] sm:$0x3]  ;;  %v411_v31 = vld [vmem:[#allocation8 + $0x110] sm:$0xff]  ;;  %v410_v37 = vld [vmem:[#allocation8 + $0x108] sm:$0xff] }
  0x48   :  { %318 = vmatpush.msrb.mxu0 %v215_v10  ;;  %450 = vmatpush.msrb.mxu2 %v401_v49  ;;  %v420_v10 = vld [vmem:[#allocation8 + $0x158] sm:$0xff]  ;;  %v383_v34 = vld [vmem:[#allocation8 + $0x30] sm:$0xff]  ;;  %v382_v39 = vld [vmem:[#allocation8 + $0x28] sm:$0xff] }
  0x49   :  { %338 = vmatpush.msrb.mxu1 %v247_v11  ;;  %471 = vmatpush.msrb.mxu3 %v431_v50  ;;  %v417_v11 = vld [vmem:[#allocation8 + $0x140] sm:$0xff]  ;;  %v388_v28 = vld [vmem:[#allocation8 + $0x58] sm:$0xff]  ;;  %v379_v40 = vld [vmem:[#allocation8 + $0x10] sm:$0xff] }
  0x4a   :  { %319 = vmatpush.msrb.mxu0 %v213_v12  ;;  %451 = vmatpush.msrb.mxu2 %v399_v53  ;;  %v154_v12 = vperm.slane %v152_v9, 0  ;;  %v412_v33 = vld [vmem:[#allocation8 + $0x118] sm:$0xff]  ;;  %v377_v42 = vld [vmem:[#allocation8] sm:$0xff]  ;;  %v559_v45 = vld [vmem:[#allocation10 + $0xf0] sm:$0xff] }
  0x4b   :  { %339 = vmatpush.msrb.mxu1 %v245_v13  ;;  %472 = vmatpush.msrb.mxu3 %v429_v54  ;;  %v155_v13 = vperm.slane %v152_v9, 1  ;;  %v384_v36 = vld [vmem:[#allocation8 + $0x38] sm:$0xff]  ;;  %v542_v49 = vld [vmem:[#allocation10 + $0x68] sm:$0xff]  ;;  %v557_v50 = vld [vmem:[#allocation10 + $0xe0] sm:$0xff] }
  0x4c   :  { %320 = vmatpush.msrb.mxu0 %v211_v14  ;;  %452 = vmatpush.msrb.mxu2 %v397_v57  ;;  %v544_v46 = vld [vmem:[#allocation10 + $0x78] sm:$0xff] }
  0x4d   :  { %340 = vmatpush.msrb.mxu1 %v243_v15  ;;  %473 = vmatpush.msrb.mxu3 %v427_v58  ;;  %v556_v53 = vld [vmem:[#allocation10 + $0xd8] sm:$0xff] }
  0x4e   :  { %321 = vmatpush.msrb.mxu0 %v209_v16  ;;  %453 = vmatpush.msrb.mxu2 %v395_v61  ;;  %v540_v54 = vld [vmem:[#allocation10 + $0x58] sm:$0xff] }
  0x4f   :  { %341 = vmatpush.msrb.mxu1 %v241_v17  ;;  %474 = vmatpush.msrb.mxu3 %v425_v62  ;;  %v365_v57 = vld [vmem:[#allocation7] sm:$0x3] }
  0x50   :  { %322 = vmatpush.msrb.mxu0 %v207_v18  ;;  %454 = vmatpush.msrb.mxu2 %v393_v1  ;;  %v264_v61 = vld [vmem:[%s910_s5] sm:$0x3]  ;;  %v368_v62 = vperm.slane %v365_v57, 1 }
  0x51   :  { %342 = vmatpush.msrb.mxu1 %v239_v22  ;;  %475 = vmatpush.msrb.mxu3 %v423_v2  ;;  %v389_v22 = vld [vmem:[#allocation8 + $0x60] sm:$0xff]  ;;  %v267_v2 = vperm.slane %v264_v61, 1 }
  0x52   :  { %323 = vmatpush.msrb.mxu0 %v205_v21  ;;  %455 = vmatpush.msrb.mxu2 %v391_v5  ;;  %v418_v21 = vld [vmem:[#allocation8 + $0x148] sm:$0xff] }
  0x53   :  { %343 = vmatpush.msrb.mxu1 %v237_v26  ;;  %476 = vmatpush.msrb.mxu3 %v421_v6  ;;  %v387_v26 = vld [vmem:[#allocation8 + $0x50] sm:$0xff]  ;;  %v367_v6 = vperm.slane %v365_v57, 0 }
  0x54   :  { %324 = vmatpush.msrb.mxu0 %v203_v25  ;;  %456 = vmatpush.msrb.mxu2 %v389_v22  ;;  %v416_v25 = vld [vmem:[#allocation8 + $0x138] sm:$0xff] }
  0x55   :  { %344 = vmatpush.msrb.mxu1 %v235_v30  ;;  %477 = vmatpush.msrb.mxu3 %v419_v8  ;;  %v385_v30 = vld [vmem:[#allocation8 + $0x40] sm:$0xff] }
  0x56   :  { %325 = vmatpush.msrb.mxu0 %v201_v29  ;;  %457 = vmatpush.msrb.mxu2 %v387_v26  ;;  %v414_v29 = vld [vmem:[#allocation8 + $0x128] sm:$0xff] }
  0x57   :  { %345 = vmatpush.msrb.mxu1 %v233_v32  ;;  %478 = vmatpush.msrb.mxu3 %v417_v11  ;;  %v386_v32 = vld [vmem:[#allocation8 + $0x48] sm:$0xff] }
  0x58   :  { %487 = vmatpush.msra.mxu0 %v408_v41  ;;  %458 = vmatpush.msrb.mxu2 %v385_v30  ;;  %v380_v41 = vld [vmem:[#allocation8 + $0x18] sm:$0xff]  ;;  %v550_v26 = vld [vmem:[#allocation10 + $0xa8] sm:$0xff] }
  0x59   :  { %507 = vmatpush.msra.mxu1 %v440_v35  ;;  %479 = vmatpush.msrb.mxu3 %v415_v23  ;;  %v409_v35 = vld [vmem:[#allocation8 + $0x100] sm:$0xff]  ;;  %v538_v23 = vld [vmem:[#allocation10 + $0x48] sm:$0xff]  ;;  %v548_v30 = vld [vmem:[#allocation10 + $0x98] sm:$0xff] }
  0x5a   :  { %488 = vmatpush.msra.mxu0 %v406_v44  ;;  %459 = vmatpush.msrb.mxu2 %v383_v34  ;;  %v560_v44 = vld [vmem:[#allocation10 + $0xf8] sm:$0xff]  ;;  %v546_v34 = vld [vmem:[#allocation10 + $0x88] sm:$0xff] }
  0x5b   :  { %508 = vmatpush.msra.mxu1 %v438_v38  ;;  %480 = vmatpush.msrb.mxu3 %v413_v27  ;;  %v381_v38 = vld [vmem:[#allocation8 + $0x20] sm:$0xff]  ;;  %v536_v27 = vld [vmem:[#allocation10 + $0x38] sm:$0xff] }
  0x5c   :  { %489 = vmatpush.msra.mxu0 %v404_v47  ;;  %460 = vmatpush.msrb.mxu2 %v381_v38  ;;  %v543_v47 = vld [vmem:[#allocation10 + $0x70] sm:$0xff]  ;;  %v530_v38 = vld [vmem:[#allocation10 + $0x8] sm:$0xff] }
  0x5d   :  { %509 = vmatpush.msra.mxu1 %v436_v43  ;;  %481 = vmatpush.msrb.mxu3 %v411_v31  ;;  %v378_v43 = vld [vmem:[#allocation8 + $0x8] sm:$0xff] }
  0x5e   :  { %490 = vmatpush.msra.mxu0 %v402_v51  ;;  %461 = vmatpush.msrb.mxu2 %v379_v40  ;;  %v352_v51 = vld [vmem:[%s911_s6] sm:$0x3]  ;;  %v534_v31 = vld [vmem:[#allocation10 + $0x28] sm:$0xff] }
  0x5f   :  { %510 = vmatpush.msra.mxu1 %v434_v48  ;;  %482 = vmatpush.msrb.mxu3 %v409_v35  ;;  %v558_v48 = vld [vmem:[#allocation10 + $0xe8] sm:$0xff]  ;;  %v359_v1 = vperm.slane %v352_v51, 0  ;;  %v532_v35 = vld [vmem:[#allocation10 + $0x18] sm:$0xff] }
  0x60   :  { %491 = vmatpush.msra.mxu0 %v400_v55  ;;  %462 = vmatpush.msrb.mxu2 %v377_v42  ;;  %v360_v55 = vperm.slane %v352_v51, 1  ;;  %v441_v40 = vld [vmem:[%s914_s9] sm:$0x3]  ;;  %s800_s9 = smov [#allocation11]  }
  0x61   :  { %511 = vmatpush.msra.mxu1 %v432_v52  ;;  %v541_v52 = vld [vmem:[#allocation10 + $0x60] sm:$0xff]  ;;  %s611_s4 = sshll.u32 %s800_s9, 4  ;;  %s612_s4 = int_to_ptr.vmem [resolvable:$true] %s611_s4 }
  0x62   :  { %492 = vmatpush.msra.mxu0 %v398_v59  ;;  %v539_v59 = vld [vmem:[#allocation10 + $0x50] sm:$0xff] }
  0x63   :  { %512 = vmatpush.msra.mxu1 %v430_v56  ;;  %v555_v56 = vld [vmem:[#allocation10 + $0xd0] sm:$0xff] }
  0x64   :  { %493 = vmatpush.msra.mxu0 %v396_v63 }
  0x65   :  { %513 = vmatpush.msra.mxu1 %v428_v60  ;;  %v554_v60 = vld [vmem:[#allocation10 + $0xc8] sm:$0xff] }
  0x66   :  { %494 = vmatpush.msra.mxu0 %v394_v3  ;;  %v552_v3 = vld [vmem:[#allocation10 + $0xb8] sm:$0xff] }
  0x67   :  { %514 = vmatpush.msra.mxu1 %v426_v0  ;;  %v553_v0 = vld [vmem:[#allocation10 + $0xc0] sm:$0xff] }
  0x68   :  { %495 = vmatpush.msra.mxu0 %v392_v20 }
  0x69   :  { %515 = vmatpush.msra.mxu1 %v424_v4 }
  0x6a   :  { %496 = vmatpush.msra.mxu0 %v390_v24  ;;  %v551_v24 = vld [vmem:[#allocation10 + $0xb0] sm:$0xff] }
  0x6b   :  { %516 = vmatpush.msra.mxu1 %v422_v7 }
  0x6c   :  { %497 = vmatpush.msra.mxu0 %v388_v28  ;;  %v549_v28 = vld [vmem:[#allocation10 + $0xa0] sm:$0xff] }
  0x6d   :  { %517 = vmatpush.msra.mxu1 %v420_v10 }
  0x6e   :  { %498 = vmatpush.msra.mxu0 %v386_v32  ;;  %v547_v32 = vld [vmem:[#allocation10 + $0x90] sm:$0xff] }
  0x6f   :  { %518 = vmatpush.msra.mxu1 %v418_v21 }
  0x70   :  { %499 = vmatpush.msra.mxu0 %v384_v36  ;;  %v545_v36 = vld [vmem:[#allocation10 + $0x80] sm:$0xff] }
  0x71   :  { %519 = vmatpush.msra.mxu1 %v416_v25  ;;  %v537_v25 = vld [vmem:[#allocation10 + $0x40] sm:$0xff] }
  0x72   :  { %500 = vmatpush.msra.mxu0 %v382_v39  ;;  %v529_v39 = vld [vmem:[#allocation10] sm:$0xff] }
  0x73   :  { %520 = vmatpush.msra.mxu1 %v414_v29  ;;  %v535_v29 = vld [vmem:[#allocation10 + $0x30] sm:$0xff] }
  0x74   :  { %501 = vmatpush.msra.mxu0 %v380_v41  ;;  %v444_v41 = vperm.slane %v441_v40, 1 }
  0x75   :  { %521 = vmatpush.msra.mxu1 %v412_v33  ;;  %v533_v33 = vld [vmem:[#allocation10 + $0x20] sm:$0xff] }
  0x76   :  { %502 = vmatpush.msra.mxu0 %v378_v43 }
  0x77   :  { %522 = vmatpush.msra.mxu1 %v410_v37  ;;  %v531_v37 = vld [vmem:[#allocation10 + $0x10] sm:$0xff] }
  0xb2   :  { %v356_v58 = vpop.permute.xlu0 %355 }
  0xb3   :  { %v364_v63 = vmul.f32 %v360_v55, %v356_v58  ;;  %v363_v7 = vmul.f32 %v359_v1, %v356_v58 }
  0xb4   :  { %v175_v14 = vpop.f32.mrf.mxu0 }
  0xb5   :  { %v195_v15 = vpop.f32.mrf.mxu1  ;;  %v176_v16 = vadd.f32 %v175_v14, %v154_v12  ;;  %v372_v4 = vadd.f32 %v368_v62, %v364_v63  ;;  %v266_v12 = vperm.slane %v264_v61, 0 }
  0xb6   :  { %v196_v17 = vadd.f32 %v195_v15, %v155_v13  ;;  %v371_v13 = vadd.f32 %v367_v6, %v363_v7 }
  0xb7   :  { %v198_v18 = vmax.f32 %v176_v16, 0.0  ;;  %v374_v10 = vmax.f32 %v372_v4, 0.0 }
  0xb8   :  { %v199_v19 = vmax.f32 %v196_v17, 0.0 }
  0xb9   :  { %286 = vmatmul.f32.vlgmr.msra.gmra.mxu2 %v198_v18  ;;  %326 = vmatmul.f32.vlgmr.msrb.gmra.mxu0 %v198_v18 }
  0xba   :  { %306 = vmatmul.f32.vlgmr.msra.gmra.mxu3 %v199_v19  ;;  %346 = vmatmul.f32.vlgmr.msrb.gmra.mxu1 %v199_v19  ;;  %v373_v19 = vmax.f32 %v371_v13, 0.0 }
  0xbb   :  { %585 = vmatpush.msra.mxu3 %v560_v44  ;;  %565 = vmatpush.msra.mxu2 %v544_v46  ;;  %v443_v46 = vperm.slane %v441_v40, 0 }
  0xbd   :  { %586 = vmatpush.msra.mxu3 %v559_v45  ;;  %566 = vmatpush.msra.mxu2 %v543_v47 }
  0xbf   :  { %587 = vmatpush.msra.mxu3 %v558_v48  ;;  %567 = vmatpush.msra.mxu2 %v542_v49 }
  0xc1   :  { %588 = vmatpush.msra.mxu3 %v557_v50  ;;  %568 = vmatpush.msra.mxu2 %v541_v52 }
  0xc3   :  { %589 = vmatpush.msra.mxu3 %v556_v53  ;;  %569 = vmatpush.msra.mxu2 %v540_v54  ;;  %v637_v53 = vld [vmem:[%s916_s11] ss:$0 sm:$0xff] }
  0xc5   :  { %590 = vmatpush.msra.mxu3 %v555_v56  ;;  %570 = vmatpush.msra.mxu2 %v539_v59 }
  0xc7   :  { %591 = vmatpush.msra.mxu3 %v554_v60  ;;  %571 = vmatpush.msra.mxu2 %v538_v23 }
  0xc9   :  { %592 = vmatpush.msra.mxu3 %v553_v0  ;;  %572 = vmatpush.msra.mxu2 %v537_v25 }
  0xcb   :  { %593 = vmatpush.msra.mxu3 %v552_v3  ;;  %573 = vmatpush.msra.mxu2 %v536_v27 }
  0xcd   :  { %594 = vmatpush.msra.mxu3 %v551_v24  ;;  %574 = vmatpush.msra.mxu2 %v535_v29 }
  0xcf   :  { %595 = vmatpush.msra.mxu3 %v550_v26  ;;  %575 = vmatpush.msra.mxu2 %v534_v31 }
  0xd1   :  { %596 = vmatpush.msra.mxu3 %v549_v28  ;;  %576 = vmatpush.msra.mxu2 %v533_v33 }
  0xd3   :  { %597 = vmatpush.msra.mxu3 %v548_v30  ;;  %577 = vmatpush.msra.mxu2 %v532_v35 }
  0xd5   :  { %598 = vmatpush.msra.mxu3 %v547_v32  ;;  %578 = vmatpush.msra.mxu2 %v531_v37 }
  0xd7   :  { %599 = vmatpush.msra.mxu3 %v546_v34  ;;  %579 = vmatpush.msra.mxu2 %v530_v38 }
  0xd9   :  { %600 = vmatpush.msra.mxu3 %v545_v36  ;;  %580 = vmatpush.msra.mxu2 %v529_v39 }
 0x136   :  { %v327_v5 = vpop.f32.mrf.mxu0 }
 0x137   :  { %v328_v8 = vadd.f32 %v327_v5, %v267_v2  ;;  %v347_v9 = vpop.f32.mrf.mxu1 }
 0x139   :  { %v348_v11 = vadd.f32 %v347_v9, %v328_v8 }
 0x13b   :  { %v351_v14 = vmax.f32 %v348_v11, 0.0 }
 0x13c   :  { %v287_v15 = vpop.f32.mrf.mxu2 }
 0x13d   :  { %v376_v16 = vmul.f32 %v374_v10, %v351_v14  ;;  %v288_v17 = vadd.f32 %v287_v15, %v266_v12  ;;  %v307_v18 = vpop.f32.mrf.mxu3 }
 0x13f   :  { %v308_v20 = vadd.f32 %v307_v18, %v288_v17  ;;  %483 = vmatmul.f32.vlgmr.msrb.gmra.mxu3 %v376_v16  ;;  %523 = vmatmul.f32.vlgmr.msra.gmra.mxu1 %v376_v16 }
 0x141   :  { %v350_v21 = vmax.f32 %v308_v20, 0.0 }
 0x143   :  { %v375_v22 = vmul.f32 %v373_v19, %v350_v21 }
 0x145   :  { %463 = vmatmul.f32.vlgmr.msrb.gmra.mxu2 %v375_v22  ;;  %503 = vmatmul.f32.vlgmr.msra.gmra.mxu0 %v375_v22 }
 0x1bc   :  { %v524_v44 = vpop.f32.mrf.mxu1 }
 0x1c2   :  { %v504_v42 = vpop.f32.mrf.mxu0  ;;  %v484_v50 = vpop.f32.mrf.mxu3 }
 0x1c3   :  { %v505_v43 = vadd.f32 %v504_v42, %v444_v41 }
 0x1c5   :  { %v525_v45 = vadd.f32 %v524_v44, %v505_v43 }
 0x1c7   :  { %v528_v47 = vmax.f32 %v525_v45, 0.0 }
 0x1c8   :  { %v464_v48 = vpop.f32.mrf.mxu2 }
 0x1c9   :  { %v465_v49 = vadd.f32 %v464_v48, %v443_v46  ;;  %601 = vmatmul.f32.vlgmr.msra.gmra.mxu3 %v528_v47 }
 0x1cb   :  { %v485_v51 = vadd.f32 %v484_v50, %v465_v49 }
 0x1cd   :  { %v527_v52 = vmax.f32 %v485_v51, 0.0 }
 0x1cf   :  { %581 = vmatmul.f32.vlgmr.msra.gmra.mxu2 %v527_v52 }
 0x24c   :  { %v602_v56 = vpop.f32.mrf.mxu3 }
 0x252   :  { %v582_v54 = vpop.f32.mrf.mxu2 }
 0x253   :  { %v583_v55 = vadd.f32 %v637_v53, %v582_v54 }
 0x255   :  { %v603_v57 = vadd.f32 %v602_v56, %v583_v55 }
 0x257   :  { %605 = vst [vmem:[#allocation11] sm:$0xff] %v603_v57 }
 0x258   :  { %616 = dma.vmem_to_hbm [thread:$0]  %s612_s4, 128, %s614_s20, [#allocation4]  }
 0x259   :  { %788 = dma.done.wait [#allocation4], 128  }
 0x25a   :  { %789 = vsyncadd [#allocation4], 4294967168 }
 0x25b   :  { %621 = vsyncpa [#allocation3], 1 }
 0x25c   :  { %622 = vsyncpa [#allocation6], 1 }
 0x25d   :  { %623 = vsyncpa [#allocation9], 1 }
 0x25e   :  { %624 = vsyncpa [#allocation4], 1 }

</bundles_post_ra>
